<compile_context>
chip_gen: v5e
topology: v5e:2x2
jax: 0.10.0
libtpu: 0.0.40
codegen_flags: <defaults>
</compile_context>

<pallas_src>
import functools

import jax
import jax.numpy as jnp
from jax.experimental import pallas as pl
from jax.experimental.pallas import tpu as pltpu


# --------------------------------------------------------------------------- kernel


def _gcn_kernel(a_ref, h_ref, w_ref, gb_ref, out_ref, acc_ref, *,
                eps, is_linear, fold_bn_after_matmul):
    k = pl.program_id(1)

    @pl.when(k == 0)
    def _():
        acc_ref[...] = jnp.zeros_like(acc_ref)

    # ---- partial A_tile @ H_tile (bf16 MXU, f32 accumulation in VMEM scratch) ----
    # a_ref: (B, TV, TK) bf16   h_ref: (B, TK, Din) bf16   acc: (B, TV, Din) f32
    acc_ref[...] += jnp.einsum(
        "bij,bjd->bid", a_ref[...], h_ref[...], preferred_element_type=jnp.float32)

    @pl.when(k == pl.num_programs(1) - 1)
    def _():
        x = acc_ref[...]                              # (B, TV, Din) f32
        B, TV, Din = x.shape
        inv_n = 1.0 / (B * Din)

        # ---- BatchNorm1d(num_vertices): per-vertex stats over (batch, feature) ----
        # two-pass (centered) variance: no catastrophic cancellation.
        mean = jnp.sum(jnp.sum(x, axis=2, keepdims=True), axis=0, keepdims=True) * inv_n
        d = x - mean
        var = jnp.sum(jnp.sum(d * d, axis=2, keepdims=True), axis=0, keepdims=True) * inv_n
        inv = jax.lax.rsqrt(var + eps)                # EUP slot

        gb = gb_ref[...].astype(jnp.float32)          # (TV, 2) = [gamma | beta]
        gamma = gb[:, 0:1].reshape(1, TV, 1)
        beta = gb[:, 1:2].reshape(1, TV, 1)
        scale = inv * gamma                           # (1, TV, 1)

        w = w_ref[...]                                # (Din, Dout_pad) bf16
        if fold_bn_after_matmul:
            # y = scale * (d @ W) + beta * (1^T W) — valid because scale/beta are
            # constant along the contraction (Din) axis; profitable only when
            # Din > Dout_pad (moves the FMA pass onto the smaller tile).
            dw = jnp.dot(d.reshape(B * TV, Din).astype(w.dtype), w,
                         preferred_element_type=jnp.float32).reshape(B, TV, -1)
            colsum_w = jnp.sum(w.astype(jnp.float32), axis=0).reshape(1, 1, -1)
            y = scale * dw + beta * colsum_w
        else:
            xn = d * scale + beta                     # single FMA pass over (B,TV,Din)
            y = jnp.dot(xn.reshape(B * TV, Din).astype(w.dtype), w,
                        preferred_element_type=jnp.float32).reshape(B, TV, -1)

        if not is_linear:
            y = jnp.maximum(y, 0.0)

        out_ref[...] = y.astype(out_ref.dtype)


# --------------------------------------------------------------------------- helpers


def _device_kind():
    try:
        return jax.devices()[0].device_kind.lower()
    except Exception:
        return ""


def _max_vertex_tile():
    """MXU row count: 128 through v5, 256 on v6e/v7x."""
    kind = _device_kind()
    if any(g in kind for g in ("v2", "v3", "v4", "v5")):
        return 128
    return 256


def _pick_vertex_tile(V, max_tile):
    """Largest multiple-of-8 divisor of V that is <= max_tile AND leaves >= 2 grid
    steps (v7x megacore sharding + pipeline overlap need >= 2 iterations)."""
    best = 0
    hi = min(max_tile, V)
    for t in range(8, hi + 1, 8):
        if V % t == 0 and V // t >= 2:
            best = t
    if best:
        return best
    for t in range(hi - hi % 8, 7, -8):
        if V % t == 0:
            return t
    return V  # fallback: single full-V block (allowed: equals full array dim)


def _pick_k_tile(V, max_tile=512):
    """Contraction-axis tile of A@H.  Must be a multiple of 128 (lane dim of the A
    block) unless it equals full V.  Caps the resident H slice so the kernel stays
    inside VMEM as V grows (esp. v7x's 64 MiB)."""
    if V <= max_tile:
        return V
    for t in range(max_tile - max_tile % 128, 127, -128):
        if V % t == 0:
            return t
    return V


def _w_spec(shape, index_map, nbytes):
    """Grid-invariant weight block: single-buffer it when it is big enough to matter
    (halves its VMEM footprint — relevant on v7x).  Small blocks keep the default."""
    if nbytes >= (512 << 10):
        try:
            return pl.BlockSpec(shape, index_map, pipeline_mode=pl.Buffered(1))
        except Exception:
            pass
    return pl.BlockSpec(shape, index_map)


def _maybe_vmem_limit(need_bytes):
    """Raise the scoped-VMEM limit only when the tiles need it; cap lower on v7x
    (64 MiB physical per TensorCore) than on v5e/v6e (128 MiB)."""
    headroom = 4 << 20
    if need_bytes + headroom <= (24 << 20):
        return None
    cap = (48 << 20) if "v7" in _device_kind() else (100 << 20)
    return int(min(need_bytes + headroom, cap))


# --------------------------------------------------------------------------- wrapper


def gcn_layer(A, H, W, gamma, beta, *, eps=1e-5, is_linear=False,
              tv=None, tk=None, out_dtype=jnp.float32):
    """Pallas GCN layer.  A: (B,V,V)  H: (B,V,Din)  W: (Din,Dout)  gamma/beta: (V,)."""
    Bb, V, Vk = A.shape
    assert Vk == V, "A must be (B, V, V)"
    Din = H.shape[-1]
    Dout = W.shape[-1]

    # Lane-dense output: pad Dout to a multiple of 128 (unmasked stores).  Zero W
    # columns stay exactly zero through matmul + ReLU; sliced off after the call.
    Dout_pad = pl.cdiv(Dout, 128) * 128
    W_p = W if Dout_pad == Dout else jnp.pad(W, ((0, 0), (0, Dout_pad - Dout)))

    # bf16 MXU operands (f32 accumulation inside the kernel).  Pre-cast halves A's
    # HBM read and VMEM tile bytes; in a fused model the producer emits bf16 directly.
    A_c = A.astype(jnp.bfloat16)
    H_c = H.astype(jnp.bfloat16)
    W_c = W_p.astype(jnp.bfloat16)

    if tv is None:
        tv = _pick_vertex_tile(V, _max_vertex_tile())
    if tk is None:
        tk = _pick_k_tile(V)
    assert V % tv == 0 and V % tk == 0, "tiles must divide V"
    grid = (V // tv, V // tk)  # reduction (k) axis last, marked "arbitrary"

    # gamma/beta packed into one (V, 2) array -> one (tv, 2) block per grid step.
    gb = jnp.stack([jnp.asarray(gamma, jnp.float32),
                    jnp.asarray(beta, jnp.float32)], axis=-1)

    fold = Din > Dout_pad
    kernel = functools.partial(_gcn_kernel, eps=eps, is_linear=is_linear,
                               fold_bn_after_matmul=fold)

    out_isz = jnp.dtype(out_dtype).itemsize
    flops = 2 * Bb * V * V * Din + 2 * Bb * V * Din * Dout_pad
    bytes_accessed = (A_c.size * 2 + H_c.size * 2 + W_c.size * 2
                      + Bb * V * Dout_pad * out_isz + V * 2 * 4)

    w_bytes = Din * Dout_pad * 2
    vmem_need = (2 * Bb * tv * tk * 2          # A tiles (double-buffered, bf16)
                 + 2 * Bb * tk * Din * 2       # H tiles (double-buffered, bf16)
                 + w_bytes                     # W (single-buffered when large)
                 + 2 * tv * 2 * 4              # gamma/beta tiles
                 + 2 * Bb * tv * Dout_pad * out_isz  # out tiles
                 + Bb * tv * Din * 4)          # f32 accumulator scratch

    out = pl.pallas_call(
        kernel,
        out_shape=jax.ShapeDtypeStruct((Bb, V, Dout_pad), out_dtype),
        grid=grid,
        in_specs=[
            pl.BlockSpec((Bb, tv, tk), lambda v, k: (0, v, k)),    # A: rows x contraction
            pl.BlockSpec((Bb, tk, Din), lambda v, k: (0, k, 0)),   # H: contraction-tiled
            _w_spec((Din, Dout_pad), lambda v, k: (0, 0), w_bytes),  # W: grid-invariant
            pl.BlockSpec((tv, 2), lambda v, k: (v, 0)),            # [gamma | beta] tile
        ],
        out_specs=pl.BlockSpec((Bb, tv, Dout_pad), lambda v, k: (0, v, 0)),
        scratch_shapes=[pltpu.VMEM((Bb, tv, Din), jnp.float32)],
        compiler_params=pltpu.CompilerParams(
            dimension_semantics=("parallel", "arbitrary"),
            vmem_limit_bytes=_maybe_vmem_limit(vmem_need)),
        cost_estimate=pl.CostEstimate(
            flops=flops, transcendentals=V, bytes_accessed=bytes_accessed),
    )(A_c, H_c, W_c, gb)

    return out[..., :Dout] if Dout_pad != Dout else out


# --------------------------------------------------------------------------- reference


def _reference(A, H, W, gamma, beta, eps=1e-5, is_linear=False):
    hp = jax.lax.Precision.HIGHEST
    x = jnp.einsum("bij,bjd->bid", A, H, precision=hp)
    mean = x.mean(axis=(0, 2), keepdims=True)
    var = ((x - mean) ** 2).mean(axis=(0, 2), keepdims=True)
    xn = (x - mean) / jnp.sqrt(var + eps)
    xn = xn * gamma.reshape(1, -1, 1) + beta.reshape(1, -1, 1)
    y = jnp.einsum("bvd,de->bve", xn, W, precision=hp)
    return y if is_linear else jnp.maximum(y, 0.0)


if __name__ == "__main__":
    key = jax.random.PRNGKey(0)
    k_a, k_h, k_w = jax.random.split(key, 3)

    # Small shapes: 2 graphs, 128 vertices, 32-dim in, 32-dim out.
    B, V, Din, Dout = 2, 128, 32, 32

    A = jax.random.uniform(k_a, (B, V, V), dtype=jnp.float32)   # dense synthetic adjacency
    H = jax.random.normal(k_h, (B, V, Din), dtype=jnp.float32)  # vertex embeddings

    # Parameters mimicking the PyTorch module init:
    #   W: kaiming_normal_ on (dim_in, dim_out) -> std = sqrt(2 / fan_in), fan_in = dim_out
    W = jax.random.normal(k_w, (Din, Dout), dtype=jnp.float32) * jnp.sqrt(2.0 / Dout)
    gamma = jnp.ones((V,), dtype=jnp.float32)   # BatchNorm1d affine at init
    beta = jnp.zeros((V,), dtype=jnp.float32)

    fn = jax.jit(functools.partial(gcn_layer, is_linear=False))
    out = jax.block_until_ready(fn(A, H, W, gamma, beta))

    ref = _reference(A, H, W, gamma, beta)
    assert out.shape == (B, V, Dout), out.shape
    # Tolerance sized for bf16 MXU operands (reference is full-f32 HIGHEST precision).
    max_err = float(jnp.max(jnp.abs(out - ref)))
    assert jnp.allclose(out, ref, atol=5e-2, rtol=5e-2), (
        "mismatch vs reference: max abs err = %e" % max_err)

    print("KERNEL_OK")
</pallas_src>

<mosaic_0001>
module attributes {stable_mosaic.version = 11 : i64} {
  func.func @_gcn_kernel(%arg0: i32, %arg1: i32, %arg2: memref<2x64x128xbf16, #tpu.memory_space<vmem>>, %arg3: memref<2x128x32xbf16, #tpu.memory_space<vmem>>, %arg4: memref<32x128xbf16, #tpu.memory_space<vmem>>, %arg5: memref<64x2xf32, #tpu.memory_space<vmem>>, %arg6: memref<2x64x128xf32, #tpu.memory_space<vmem>>, %arg7: memref<2x64x32xf32, #tpu.memory_space<vmem>>) attributes {dimension_semantics = [#tpu.dimension_semantics<parallel>, #tpu.dimension_semantics<arbitrary>], iteration_bounds = array<i64: 2, 1>, scalar_prefetch = 0 : i64, scratch_operands = 1 : i64, tpu.core_type = #tpu.core_type<tc>, window_params = [{transform_indices = @transform_0, window_bounds = array<i64: 2, 64, 128>}, {transform_indices = @transform_1, window_bounds = array<i64: 2, 128, 32>}, {pipeline_mode = #tpu.pipeline_mode<synchronous>, transform_indices = @transform_2, window_bounds = array<i64: 32, 128>}, {transform_indices = @transform_3, window_bounds = array<i64: 64, 2>}, {transform_indices = @transform_4, window_bounds = array<i64: 2, 64, 128>}]} {
    %c0_i32 = arith.constant 0 : i32
    %0 = arith.cmpi eq, %arg1, %c0_i32 : i32
    %1 = arith.extui %0 : i1 to i32
    %c0_i32_0 = arith.constant 0 : i32
    %2 = arith.cmpi ne, %1, %c0_i32_0 : i32
    scf.if %2 {
      %cst_14 = arith.constant 0.000000e+00 : f32
      %12 = vector.broadcast %cst_14 : f32 to vector<2x64x32xf32>
      %c0_15 = arith.constant 0 : index
      %c0_16 = arith.constant 0 : index
      %c0_17 = arith.constant 0 : index
      %13 = vector.load %arg7[%c0_15, %c0_16, %c0_17] : memref<2x64x32xf32, #tpu.memory_space<vmem>>, vector<2x64x32xf32>
      tpu.vector_store %arg7[%c0_15, %c0_16, %c0_17], %12 {strides = array<i32>} : memref<2x64x32xf32, #tpu.memory_space<vmem>>, vector<2x64x32xf32>,
    } else {
    }
    %c0 = arith.constant 0 : index
    %c0_1 = arith.constant 0 : index
    %c0_2 = arith.constant 0 : index
    %3 = vector.load %arg7[%c0, %c0_1, %c0_2] : memref<2x64x32xf32, #tpu.memory_space<vmem>>, vector<2x64x32xf32>
    %c0_3 = arith.constant 0 : index
    %c0_4 = arith.constant 0 : index
    %c0_5 = arith.constant 0 : index
    %4 = vector.load %arg2[%c0_3, %c0_4, %c0_5] : memref<2x64x128xbf16, #tpu.memory_space<vmem>>, vector<2x64x128xbf16>
    %c0_6 = arith.constant 0 : index
    %c0_7 = arith.constant 0 : index
    %c0_8 = arith.constant 0 : index
    %5 = vector.load %arg3[%c0_6, %c0_7, %c0_8] : memref<2x128x32xbf16, #tpu.memory_space<vmem>>, vector<2x128x32xbf16>
    "tpu.trace_start"() <{level = 10 : i32, message = "bij,bjd->bid"}> : () -> ()
    %cst = arith.constant dense<0.000000e+00> : vector<2x64x32xf32>
    %6 = tpu.matmul %4, %5, %cst {dimension_numbers = #tpu.dot_dimension_numbers<[2], [1], [1], [2], [0, 0, 0, 1, 1, 2], [0], [0]>} : vector<2x64x128xbf16>, vector<2x128x32xbf16>, vector<2x64x32xf32> -> vector<2x64x32xf32>
    "tpu.trace_stop"() : () -> ()
    %7 = arith.addf %3, %6 : vector<2x64x32xf32>
    %c0_9 = arith.constant 0 : index
    %c0_10 = arith.constant 0 : index
    %c0_11 = arith.constant 0 : index
    %8 = vector.load %arg7[%c0_9, %c0_10, %c0_11] : memref<2x64x32xf32, #tpu.memory_space<vmem>>, vector<2x64x32xf32>
    tpu.vector_store %arg7[%c0_9, %c0_10, %c0_11], %7 {strides = array<i32>} : memref<2x64x32xf32, #tpu.memory_space<vmem>>, vector<2x64x32xf32>,
    %c0_i32_12 = arith.constant 0 : i32
    %9 = arith.cmpi eq, %arg1, %c0_i32_12 : i32
    %10 = arith.extui %9 : i1 to i32
    %c0_i32_13 = arith.constant 0 : i32
    %11 = arith.cmpi ne, %10, %c0_i32_13 : i32
    scf.if %11 {
      %c0_14 = arith.constant 0 : index
      %c0_15 = arith.constant 0 : index
      %c0_16 = arith.constant 0 : index
      %12 = vector.load %arg7[%c0_14, %c0_15, %c0_16] : memref<2x64x32xf32, #tpu.memory_space<vmem>>, vector<2x64x32xf32>
      %cst_17 = arith.constant dense<0.000000e+00> : vector<2x64xf32>
      %13 = vector.multi_reduction <add>, %12, %cst_17 [2] : vector<2x64x32xf32> to vector<2x64xf32>
      %14 = vector.shape_cast %13 : vector<2x64xf32> to vector<2x64x1xf32>
      %cst_18 = arith.constant dense<0.000000e+00> : vector<64x1xf32>
      %15 = vector.multi_reduction <add>, %14, %cst_18 [0] : vector<2x64x1xf32> to vector<64x1xf32>
      %16 = vector.shape_cast %15 : vector<64x1xf32> to vector<1x64x1xf32>
      %cst_19 = arith.constant 1.562500e-02 : f32
      %17 = vector.broadcast %cst_19 : f32 to vector<1x64x1xf32>
      %18 = arith.mulf %16, %17 : vector<1x64x1xf32>
      %19 = vector.broadcast %18 : vector<1x64x1xf32> to vector<2x64x32xf32>
      %20 = arith.subf %12, %19 : vector<2x64x32xf32>
      %21 = arith.mulf %20, %20 : vector<2x64x32xf32>
      %cst_20 = arith.constant dense<0.000000e+00> : vector<2x64xf32>
      %22 = vector.multi_reduction <add>, %21, %cst_20 [2] : vector<2x64x32xf32> to vector<2x64xf32>
      %23 = vector.shape_cast %22 : vector<2x64xf32> to vector<2x64x1xf32>
      %cst_21 = arith.constant dense<0.000000e+00> : vector<64x1xf32>
      %24 = vector.multi_reduction <add>, %23, %cst_21 [0] : vector<2x64x1xf32> to vector<64x1xf32>
      %25 = vector.shape_cast %24 : vector<64x1xf32> to vector<1x64x1xf32>
      %cst_22 = arith.constant 1.562500e-02 : f32
      %26 = vector.broadcast %cst_22 : f32 to vector<1x64x1xf32>
      %27 = arith.mulf %25, %26 : vector<1x64x1xf32>
      %cst_23 = arith.constant 9.99999974E-6 : f32
      %28 = vector.broadcast %cst_23 : f32 to vector<1x64x1xf32>
      %29 = arith.addf %27, %28 : vector<1x64x1xf32>
      %30 = math.rsqrt %29 : vector<1x64x1xf32>
      %c0_24 = arith.constant 0 : index
      %c0_25 = arith.constant 0 : index
      %31 = vector.load %arg5[%c0_24, %c0_25] : memref<64x2xf32, #tpu.memory_space<vmem>>, vector<64x2xf32>
      %32 = vector.extract_strided_slice %31 {offsets = [0, 0], sizes = [64, 1], strides = [1, 1]} : vector<64x2xf32> to vector<64x1xf32>
      %33 = vector.shape_cast %32 : vector<64x1xf32> to vector<1x64x1xf32>
      %34 = vector.extract_strided_slice %31 {offsets = [0, 1], sizes = [64, 1], strides = [1, 1]} : vector<64x2xf32> to vector<64x1xf32>
      %35 = vector.shape_cast %34 : vector<64x1xf32> to vector<1x64x1xf32>
      %36 = arith.mulf %30, %33 : vector<1x64x1xf32>
      %c0_26 = arith.constant 0 : index
      %c0_27 = arith.constant 0 : index
      %37 = vector.load %arg4[%c0_26, %c0_27] : memref<32x128xbf16, #tpu.memory_space<vmem>>, vector<32x128xbf16>
      %38 = vector.broadcast %36 : vector<1x64x1xf32> to vector<2x64x32xf32>
      %39 = arith.mulf %20, %38 : vector<2x64x32xf32>
      %40 = vector.broadcast %35 : vector<1x64x1xf32> to vector<2x64x32xf32>
      %41 = arith.addf %39, %40 : vector<2x64x32xf32>
      %42 = vector.shape_cast %41 : vector<2x64x32xf32> to vector<128x32xf32>
      %43 = arith.truncf %42 : vector<128x32xf32> to vector<128x32xbf16>
      %cst_28 = arith.constant dense<0.000000e+00> : vector<128x128xf32>
      %44 = tpu.matmul %43, %37, %cst_28 {dimension_numbers = #tpu.dot_dimension_numbers<[1], [0], [0], [1], [0, 0, 1, 1], [], []>} : vector<128x32xbf16>, vector<32x128xbf16>, vector<128x128xf32> -> vector<128x128xf32>
      %45 = vector.shape_cast %44 : vector<128x128xf32> to vector<2x64x128xf32>
      %cst_29 = arith.constant 0.000000e+00 : f32
      %46 = vector.broadcast %cst_29 : f32 to vector<2x64x128xf32>
      %47 = arith.maximumf %45, %46 : vector<2x64x128xf32>
      %c0_30 = arith.constant 0 : index
      %c0_31 = arith.constant 0 : index
      %c0_32 = arith.constant 0 : index
      %48 = vector.load %arg6[%c0_30, %c0_31, %c0_32] : memref<2x64x128xf32, #tpu.memory_space<vmem>>, vector<2x64x128xf32>
      tpu.vector_store %arg6[%c0_30, %c0_31, %c0_32], %47 {strides = array<i32>} : memref<2x64x128xf32, #tpu.memory_space<vmem>>, vector<2x64x128xf32>,
    } else {
    }
    return
  }
  func.func @transform_0(%arg0: i32, %arg1: i32) -> (i32, i32, i32) {
    %c0_i32 = arith.constant 0 : i32
    %c0_i32_0 = arith.constant 0 : i32
    return %c0_i32, %arg0, %arg1 : i32, i32, i32
  }
  func.func @transform_1(%arg0: i32, %arg1: i32) -> (i32, i32, i32) {
    %c0_i32 = arith.constant 0 : i32
    %c0_i32_0 = arith.constant 0 : i32
    %c0_i32_1 = arith.constant 0 : i32
    return %c0_i32, %arg1, %c0_i32_0 : i32, i32, i32
  }
  func.func @transform_2(%arg0: i32, %arg1: i32) -> (i32, i32) {
    %c0_i32 = arith.constant 0 : i32
    %c0_i32_0 = arith.constant 0 : i32
    %c0_i32_1 = arith.constant 0 : i32
    return %c0_i32, %c0_i32_0 : i32, i32
  }
  func.func @transform_3(%arg0: i32, %arg1: i32) -> (i32, i32) {
    %c0_i32 = arith.constant 0 : i32
    %c0_i32_0 = arith.constant 0 : i32
    return %arg0, %c0_i32 : i32, i32
  }
  func.func @transform_4(%arg0: i32, %arg1: i32) -> (i32, i32, i32) {
    %c0_i32 = arith.constant 0 : i32
    %c0_i32_0 = arith.constant 0 : i32
    %c0_i32_1 = arith.constant 0 : i32
    return %c0_i32, %arg0, %c0_i32_0 : i32, i32, i32
  }
}

</mosaic_0001>

<bundles_post_ra>
// kernel: gcn_layer.1
= control target key start
LH: loop header
LB: loop body
LE: loop exit
PB: predicated region body
PF: predicated region fallthrough
CT: control target
= control target key end

     0   :  { %s1699_s15 = smov 0   ;;  %s1701_s16 = smov 0   ;;  %s2119_s0 = inlined_call_operand.vmem [shape: bf16[2,128,128], index: 0, kind: input, shape index: {}]   ;;  %s2120_s1 = inlined_call_operand.vmem [shape: bf16[2,128,32], index: 1, kind: input, shape index: {}]   ;;  %s2121_s2 = inlined_call_operand.vmem [shape: bf16[32,128], index: 2, kind: input, shape index: {}]   ;;  %s2122_s3 = inlined_call_operand.vmem [shape: f32[128,2], index: 3, kind: input, shape index: {}]   ;;  %s2123_s4 = inlined_call_operand.vmem [shape: f32[2,128,128], index: 4, kind: output, shape index: {}]  }
   0x1   :  { %s1703_s17 = smov 0   ;;  %s1705_s18 = smov 0  }
   0x2   :  { %s1707_s19 = smov 0  }
   0x3 LB: > { %s26_s20 = sadd.s32 1, %s1665_s18  ;;  %s1399_s21 = sadd.s32 4294967295, %s1669_s19   ;;  %s1669_s19 = sphi %s1707_s19, %s14_s19   ;;  %s1665_s18 = sphi %s1705_s18, %s2128_s18   ;;  %s1661_s17 = sphi %s1703_s17, %s2127_s17   ;;  %s1657_s16 = sphi %s1701_s16, %s2126_s16   ;;  %s1653_s15 = sphi %s1699_s15, %s2125_s15  }
   0x4   : > { %p28_p0 = scmp.ge.s32.totalorder %s26_s20, 2  ;;  %p42_p1 = scmp.ne.s32.totalorder %s1657_s16, %s1653_s15 }
   0x5   : > { %p43_p2 = scmp.eq.s32.totalorder %s1669_s19, 0  ;;  %p145_p4 = scmp.eq.s32.totalorder %s1399_s21, 1 }
   0x6   : > { %s2130_s20 = smov (%p28_p0, %s26_s20), 0  ;;  %s35_s23 = sadd.s32 1, %s1657_s16 }
   0x7   : > { %p44_p3 = por %p43_p2, %p42_p1  ;;  %s30_s22 = ssub.s32 %s1665_s18, %s2130_s20 }
   0x8   : > { %p33_p5 = scmp.eq.s32.totalorder %s30_s22, 0  ;;  %p1734_p6 = por %p145_p4, %p42_p1 }
   0x9   : > { %p1403_p7 = scmp.ge.s32.totalorder %s1669_s19, 2 }
   0xa   : > { %s1739_s25 = scalar_select %p33_p5, %s1657_s16, %s35_s23  }
   0xb   : > { %179 = sbr.rel (%p1403_p7) target bundleno = 28 (0x1c), region = 24 }
  0x10   : > { %182 = sbr.rel (!%p44_p3) target bundleno = 28 (0x1c), region = 28  ;;  %s184_s26 = sand.u32 (%p44_p3), 1, %s1657_s16  }
  0x11   : > { %s1529_s27 = sshll.u32 (%p44_p3), %s1665_s18, 5  ;;  %s1404_s28 = sshll.u32 (%p44_p3), %s184_s26, 6 }
  0x12   : > { %s190_s5 = scalar_lea.vmem (%p44_p3), %s2119_s0, %s1529_s27  ;;  %s186_s6 = scalar_lea.vmem (%p44_p3), [#allocation3], %s1404_s28 }
  0x13   : > { %v207_v0 = vld [vmem:[%s190_s5] sm:$0xff] (%p44_p3)   ;;  %v211_v1 = vld [vmem:[%s190_s5 + $0x8] sm:$0xff] (%p44_p3)   ;;  %v215_v2 = vld [vmem:[%s190_s5 + $0x10] sm:$0xff] (%p44_p3)  }
  0x14   : > { %208 = vst [vmem:[%s186_s6] sm:$0xff] (%p44_p3), %v207_v0   ;;  %v219_v3 = vld [vmem:[%s190_s5 + $0x18] sm:$0xff] (%p44_p3)   ;;  %v223_v4 = vld [vmem:[%s190_s5 + $0x40] sm:$0xff] (%p44_p3)   ;;  %v227_v5 = vld [vmem:[%s190_s5 + $0x48] sm:$0xff] (%p44_p3)  }
  0x15   : > { %212 = vst [vmem:[%s186_s6 + $0x8] sm:$0xff] %v211_v1   ;;  %v231_v6 = vld [vmem:[%s190_s5 + $0x50] sm:$0xff]   ;;  %v235_v7 = vld [vmem:[%s190_s5 + $0x58] sm:$0xff]  }
  0x16   : > { %216 = vst [vmem:[%s186_s6 + $0x10] sm:$0xff] %v215_v2  }
  0x17   : > { %220 = vst [vmem:[%s186_s6 + $0x18] sm:$0xff] %v219_v3  }
  0x18   : > { %224 = vst [vmem:[%s186_s6 + $0x20] sm:$0xff] %v223_v4  }
  0x19   : > { %228 = vst [vmem:[%s186_s6 + $0x28] sm:$0xff] %v227_v5  }
  0x1a   : > { %232 = vst [vmem:[%s186_s6 + $0x30] sm:$0xff] %v231_v6  }
  0x1b   : > { %236 = vst [vmem:[%s186_s6 + $0x38] sm:$0xff] %v235_v7  }
  0x1c PF: > { %p1407_p8 = scmp.ge.s32.totalorder %s1669_s19, 1  ;;  %p302_p9 = scmp.lt.s32.totalorder %s1669_s19, 3 }
  0x1e   : > { %p303_p10 = pnand %p1407_p8, %p302_p9 }
  0x1f   : > { %s309_s13 = sand.u32 (!%p303_p10), 1, %s1653_s15   ;;  %s1410_s6 = sshll.u32 (!%p303_p10), %s1661_s17, 3 }
  0x20   : > { %306 = sbr.rel (%p303_p10) target bundleno = 825 (0x339), region = 73  ;;  %s1408_s26 = sshll.u32 (!%p303_p10), %s309_s13, 6 }
  0x21   : > { %s1800_s5 = scalar_lea.vmem (!%p303_p10), [#allocation3], %s1408_s26  ;;  %p351_p11 = scmp.lt.s32.totalorder (!%p303_p10), %s1410_s6, 15 }
  0x22   : > { %s1409_s22 = sshll.u32 (!%p303_p10), %s309_s13, 7 }
  0x23   : > { %s2064_s23 = scalar_lea.vmem (!%p303_p10), [#allocation4], %s1409_s22 }
  0x25   : > { %v1545_v8 = vld [vmem:[%s2120_s1 + $0x38] sm:$0xff]  ;;  %v1544_v10 = vld [vmem:[%s2120_s1 + $0x30] sm:$0xff]  ;;  %v1543_v12 = vld [vmem:[%s2120_s1 + $0x28] sm:$0xff]  ;;  %vm362_vm0 = vcmask 261120   ;;  %v1671_v28 = vmov 0.0   ;;  %s2132_s6 = smov (!%p351_p11, %s1410_s6), 15 }
  0x26   : > { %v1553_v9 = vld [vmem:[%s2120_s1 + $0x78] sm:$0xff]  ;;  %515 = vmatpush.bf16.msra.mxu0 %v1545_v8  ;;  %v1552_v11 = vld [vmem:[%s2120_s1 + $0x70] sm:$0xff]  ;;  %v1551_v13 = vld [vmem:[%s2120_s1 + $0x68] sm:$0xff]  ;;  %363 = vst.msk [vmem:[#allocation2] sm:$0xff] %vm362_vm0, %v1671_v28  ;;  %s1411_s7 = sshll.u32 %s2132_s6, 3  ;;  %s1556_s15 = sshll.u32 (%p1734_p6), %s1661_s17, 6 }
  0x27   : > { %616 = vmatpush.bf16.msra.mxu1 %v1553_v9  ;;  %v1542_v14 = vld [vmem:[%s2120_s1 + $0x20] sm:$0xff]  ;;  %v1541_v16 = vld [vmem:[%s2120_s1 + $0x18] sm:$0xff]  ;;  %v1540_v18 = vld [vmem:[%s2120_s1 + $0x10] sm:$0xff]  ;;  %364 = vst.msk [vmem:[#allocation2 + $0x8] sm:$0xff] %vm362_vm0, %v1671_v28  ;;  %s2006_s10 = scalar_lea.vmem %s2122_s3, %s1411_s7  ;;  %s1211_s27 = scalar_lea.vmem (%p1734_p6), %s2123_s4, %s1556_s15 }
  0x28   : > { %v1550_v15 = vld [vmem:[%s2120_s1 + $0x60] sm:$0xff]  ;;  %v1549_v17 = vld [vmem:[%s2120_s1 + $0x58] sm:$0xff]  ;;  %v1548_v19 = vld [vmem:[%s2120_s1 + $0x50] sm:$0xff]  ;;  %365 = vst.msk [vmem:[#allocation2 + $0x10] sm:$0xff] %vm362_vm0, %v1671_v28 }
  0x29   : > { %v1539_v20 = vld [vmem:[%s2120_s1 + $0x8] sm:$0xff]  ;;  %v1538_v22 = vld [vmem:[%s2120_s1] sm:$0xff]  ;;  %366 = vst.msk [vmem:[#allocation2 + $0x18] sm:$0xff] %vm362_vm0, %v1671_v28  ;;  %v1532_v29 = vld [vmem:[%s1800_s5 + $0x10] sm:$0xff] }
  0x2a   : > { %516 = vmatpush.bf16.msra.mxu0 %v1544_v10  ;;  %v1547_v21 = vld [vmem:[%s2120_s1 + $0x48] sm:$0xff]  ;;  %v1546_v23 = vld [vmem:[%s2120_s1 + $0x40] sm:$0xff]  ;;  %367 = vst.msk [vmem:[#allocation2 + $0x20] sm:$0xff] %vm362_vm0, %v1671_v28  ;;  %v1536_v30 = vld [vmem:[%s1800_s5 + $0x30] sm:$0xff] }
  0x2b   : > { %617 = vmatpush.bf16.msra.mxu1 %v1552_v11  ;;  %v1530_v24 = vld [vmem:[%s1800_s5] sm:$0xff]  ;;  %v1531_v26 = vld [vmem:[%s1800_s5 + $0x8] sm:$0xff]  ;;  %368 = vst.msk [vmem:[#allocation2 + $0x28] sm:$0xff] %vm362_vm0, %v1671_v28  ;;  %v1533_v31 = vld [vmem:[%s1800_s5 + $0x18] sm:$0xff] }
  0x2c   : > { %v1534_v25 = vld [vmem:[%s1800_s5 + $0x20] sm:$0xff]  ;;  %v1535_v27 = vld [vmem:[%s1800_s5 + $0x28] sm:$0xff]  ;;  %369 = vst.msk [vmem:[#allocation2 + $0x30] sm:$0xff] %vm362_vm0, %v1671_v28  ;;  %v1537_v32 = vld [vmem:[%s1800_s5 + $0x38] sm:$0xff] }
  0x2d   : > { %370 = vst.msk [vmem:[#allocation2 + $0x38] sm:$0xff] %vm362_vm0, %v1671_v28  ;;  %v379_v33 = vld [vmem:[#allocation2] sm:$0xff] }
  0x2e   : > { %517 = vmatpush.bf16.msra.mxu0 %v1543_v12  ;;  %371 = vst.msk [vmem:[#allocation2 + $0x40] sm:$0xff] %vm362_vm0, %v1671_v28  ;;  %v380_v39 = vld [vmem:[#allocation2 + $0x8] sm:$0xff] }
  0x2f   : > { %618 = vmatpush.bf16.msra.mxu1 %v1551_v13  ;;  %372 = vst.msk [vmem:[#allocation2 + $0x48] sm:$0xff] %vm362_vm0, %v1671_v28  ;;  %v381_v49 = vld [vmem:[#allocation2 + $0x10] sm:$0xff] }
  0x30   : > { %373 = vst.msk [vmem:[#allocation2 + $0x50] sm:$0xff] %vm362_vm0, %v1671_v28  ;;  %v382_v59 = vld [vmem:[#allocation2 + $0x18] sm:$0xff] }
  0x31   : > { %374 = vst.msk [vmem:[#allocation2 + $0x58] sm:$0xff] %vm362_vm0, %v1671_v28  ;;  %v383_v5 = vld [vmem:[#allocation2 + $0x20] sm:$0xff] }
  0x32   : > { %518 = vmatpush.bf16.msra.mxu0 %v1542_v14  ;;  %375 = vst.msk [vmem:[#allocation2 + $0x60] sm:$0xff] %vm362_vm0, %v1671_v28 }
  0x33   : > { %619 = vmatpush.bf16.msra.mxu1 %v1550_v15  ;;  %376 = vst.msk [vmem:[#allocation2 + $0x68] sm:$0xff] %vm362_vm0, %v1671_v28  ;;  %v384_v15 = vld [vmem:[#allocation2 + $0x28] sm:$0xff] }
  0x34   : > { %377 = vst.msk [vmem:[#allocation2 + $0x70] sm:$0xff] %vm362_vm0, %v1671_v28 }
  0x35   : > { %378 = vst.msk [vmem:[#allocation2 + $0x78] sm:$0xff] %vm362_vm0, %v1671_v28  ;;  %v387_v34 = vld [vmem:[#allocation2 + $0x40] sm:$0xff] }
  0x36   : > { %519 = vmatpush.bf16.msra.mxu0 %v1541_v16  ;;  %v388_v40 = vld [vmem:[#allocation2 + $0x48] sm:$0xff] }
  0x37   : > { %620 = vmatpush.bf16.msra.mxu1 %v1549_v17  ;;  %v389_v50 = vld [vmem:[#allocation2 + $0x50] sm:$0xff] }
  0x38   : > { %v390_v60 = vld [vmem:[#allocation2 + $0x58] sm:$0xff] }
  0x39   : > { %v391_v6 = vld [vmem:[#allocation2 + $0x60] sm:$0xff] }
  0x3a   : > { %520 = vmatpush.bf16.msra.mxu0 %v1540_v18  ;;  %v392_v16 = vld [vmem:[#allocation2 + $0x68] sm:$0xff] }
  0x3b   : > { %621 = vmatpush.bf16.msra.mxu1 %v1548_v19 }
  0x3e   : > { %521 = vmatpush.bf16.msra.mxu0 %v1539_v20 }
  0x3f   : > { %622 = vmatpush.bf16.msra.mxu1 %v1547_v21 }
  0x42   : > { %522 = vmatpush.bf16.msra.mxu0 %v1538_v22 }
  0x43   : > { %623 = vmatpush.bf16.msra.mxu1 %v1546_v23 }
  0x45   : > { %523 = vmatmul.bf16.vlgmr.msra.gmra.mxu0 %v1530_v24 }
  0x46   : > { %624 = vmatmul.bf16.vlgmr.msra.gmra.mxu1 %v1534_v25  ;;  %v385_v25 = vld [vmem:[#allocation2 + $0x30] sm:$0xff] }
  0x55   : > { %528 = vmatmul.bf16.gmra.mxu0 %v1531_v26  ;;  %v393_v26 = vld [vmem:[#allocation2 + $0x70] sm:$0xff] }
  0x56   : > { %629 = vmatmul.bf16.gmra.mxu1 %v1535_v27 }
  0x65   : > { %533 = vmatmul.bf16.gmra.mxu0 %v1532_v29 }
  0x66   : > { %634 = vmatmul.bf16.gmra.mxu1 %v1536_v30 }
  0x75   : > { %538 = vmatmul.bf16.gmra.mxu0 %v1533_v31 }
  0x76   : > { %639 = vmatmul.bf16.gmra.mxu1 %v1537_v32 }
  0xc2   : > { %v524_v35 = vpop.f32.mrf.mxu0 }
  0xc3   : > { %v625_v36 = vpop.f32.mrf.mxu1  ;;  %v645_v37 = vadd.f32 %v524_v35, %v379_v33  ;;  %v386_v35 = vld [vmem:[#allocation2 + $0x38] sm:$0xff] }
  0xc4   : > { %v653_v38 = vadd.f32 %v625_v36, %v387_v34  ;;  %v394_v36 = vld [vmem:[#allocation2 + $0x78] sm:$0xff] }
  0xc5   : > { %662 = vst.msk [vmem:[#allocation2] sm:$0xff] %vm362_vm0, %v645_v37 }
  0xc6   : > { %670 = vst.msk [vmem:[#allocation2 + $0x40] sm:$0xff] %vm362_vm0, %v653_v38 }
  0xca   : > { %v526_v41 = vpop.f32.mrf.mxu0 }
  0xcb   : > { %v627_v42 = vpop.f32.mrf.mxu1  ;;  %v646_v43 = vadd.f32 %v526_v41, %v380_v39 }
  0xcc   : > { %v654_v44 = vadd.f32 %v627_v42, %v388_v40  ;;  %v1828_v45 = vld [vmem:[#allocation2] sm:$0xff] }
  0xcd   : > { %663 = vst.msk [vmem:[#allocation2 + $0x8] sm:$0xff] %vm362_vm0, %v646_v43  ;;  %v1831_v46 = vld [vmem:[#allocation2 + $0x40] sm:$0xff]  ;;  %v697_v47 = vsel %vm362_vm0, %v1828_v45, 0.0 }
  0xce   : > { %671 = vst.msk [vmem:[#allocation2 + $0x48] sm:$0xff] %vm362_vm0, %v654_v44  ;;  %v721_v48 = vsel %vm362_vm0, %v1831_v46, 0.0  ;;  %698 = vadd.xlane.f32.xlu0 %v697_v47 }
  0xcf   : > { %722 = vadd.xlane.f32.xlu1 %v721_v48 }
  0xd2   : > { %v529_v51 = vpop.f32.mrf.mxu0 }
  0xd3   : > { %v630_v52 = vpop.f32.mrf.mxu1  ;;  %v647_v53 = vadd.f32 %v529_v51, %v381_v49 }
  0xd4   : > { %v655_v54 = vadd.f32 %v630_v52, %v389_v50  ;;  %v1838_v55 = vld [vmem:[#allocation2 + $0x8] sm:$0xff] }
  0xd5   : > { %664 = vst.msk [vmem:[#allocation2 + $0x10] sm:$0xff] %vm362_vm0, %v647_v53  ;;  %v1841_v56 = vld [vmem:[#allocation2 + $0x48] sm:$0xff]  ;;  %v700_v57 = vsel %vm362_vm0, %v1838_v55, 0.0 }
  0xd6   : > { %672 = vst.msk [vmem:[#allocation2 + $0x50] sm:$0xff] %vm362_vm0, %v655_v54  ;;  %v724_v58 = vsel %vm362_vm0, %v1841_v56, 0.0  ;;  %701 = vadd.xlane.f32.xlu0 %v700_v57 }
  0xd7   : > { %725 = vadd.xlane.f32.xlu1 %v724_v58 }
  0xda   : > { %v531_v61 = vpop.f32.mrf.mxu0 }
  0xdb   : > { %v632_v62 = vpop.f32.mrf.mxu1  ;;  %v648_v63 = vadd.f32 %v531_v61, %v382_v59 }
  0xdc   : > { %v656_v0 = vadd.f32 %v632_v62, %v390_v60  ;;  %v1848_v1 = vld [vmem:[#allocation2 + $0x10] sm:$0xff] }
  0xdd   : > { %665 = vst.msk [vmem:[#allocation2 + $0x18] sm:$0xff] %vm362_vm0, %v648_v63  ;;  %v1851_v2 = vld [vmem:[#allocation2 + $0x50] sm:$0xff]  ;;  %v703_v3 = vsel %vm362_vm0, %v1848_v1, 0.0 }
  0xde   : > { %673 = vst.msk [vmem:[#allocation2 + $0x58] sm:$0xff] %vm362_vm0, %v656_v0  ;;  %v727_v4 = vsel %vm362_vm0, %v1851_v2, 0.0  ;;  %704 = vadd.xlane.f32.xlu2 %v703_v3 }
  0xdf   : > { %728 = vadd.xlane.f32.xlu0 %v727_v4 }
  0xe2   : > { %v534_v7 = vpop.f32.mrf.mxu0 }
  0xe3   : > { %v635_v8 = vpop.f32.mrf.mxu1  ;;  %v649_v9 = vadd.f32 %v534_v7, %v383_v5 }
  0xe4   : > { %v657_v10 = vadd.f32 %v635_v8, %v391_v6  ;;  %v1858_v11 = vld [vmem:[#allocation2 + $0x18] sm:$0xff] }
  0xe5   : > { %666 = vst.msk [vmem:[#allocation2 + $0x20] sm:$0xff] %vm362_vm0, %v649_v9  ;;  %v1861_v12 = vld [vmem:[#allocation2 + $0x58] sm:$0xff]  ;;  %v706_v13 = vsel %vm362_vm0, %v1858_v11, 0.0 }
  0xe6   : > { %674 = vst.msk [vmem:[#allocation2 + $0x60] sm:$0xff] %vm362_vm0, %v657_v10  ;;  %v730_v14 = vsel %vm362_vm0, %v1861_v12, 0.0  ;;  %707 = vadd.xlane.f32.xlu2 %v706_v13 }
  0xe7   : > { %731 = vadd.xlane.f32.xlu1 %v730_v14 }
  0xea   : > { %v536_v17 = vpop.f32.mrf.mxu0 }
  0xeb   : > { %v637_v18 = vpop.f32.mrf.mxu1  ;;  %v650_v19 = vadd.f32 %v536_v17, %v384_v15 }
  0xec   : > { %v658_v20 = vadd.f32 %v637_v18, %v392_v16  ;;  %v1868_v21 = vld [vmem:[#allocation2 + $0x20] sm:$0xff] }
  0xed   : > { %667 = vst.msk [vmem:[#allocation2 + $0x28] sm:$0xff] %vm362_vm0, %v650_v19  ;;  %v1871_v22 = vld [vmem:[#allocation2 + $0x60] sm:$0xff]  ;;  %v709_v23 = vsel %vm362_vm0, %v1868_v21, 0.0 }
  0xee   : > { %675 = vst.msk [vmem:[#allocation2 + $0x68] sm:$0xff] %vm362_vm0, %v658_v20  ;;  %v733_v24 = vsel %vm362_vm0, %v1871_v22, 0.0  ;;  %710 = vadd.xlane.f32.xlu2 %v709_v23 }
  0xef   : > { %734 = vadd.xlane.f32.xlu1 %v733_v24 }
  0xf2   : > { %v539_v27 = vpop.f32.mrf.mxu0 }
  0xf3   : > { %v640_v28 = vpop.f32.mrf.mxu1  ;;  %v651_v29 = vadd.f32 %v539_v27, %v385_v25 }
  0xf4   : > { %v659_v30 = vadd.f32 %v640_v28, %v393_v26  ;;  %v1878_v31 = vld [vmem:[#allocation2 + $0x28] sm:$0xff] }
  0xf5   : > { %668 = vst.msk [vmem:[#allocation2 + $0x30] sm:$0xff] %vm362_vm0, %v651_v29  ;;  %v1881_v32 = vld [vmem:[#allocation2 + $0x68] sm:$0xff]  ;;  %v712_v33 = vsel %vm362_vm0, %v1878_v31, 0.0 }
  0xf6   : > { %676 = vst.msk [vmem:[#allocation2 + $0x70] sm:$0xff] %vm362_vm0, %v659_v30  ;;  %v736_v34 = vsel %vm362_vm0, %v1881_v32, 0.0  ;;  %713 = vadd.xlane.f32.xlu0 %v712_v33 }
  0xf7   : > { %737 = vadd.xlane.f32.xlu2 %v736_v34 }
  0xfa   : > { %v541_v37 = vpop.f32.mrf.mxu0 }
  0xfb   : > { %v642_v38 = vpop.f32.mrf.mxu1  ;;  %v652_v39 = vadd.f32 %v541_v37, %v386_v35 }
  0xfc   : > { %v660_v40 = vadd.f32 %v642_v38, %v394_v36  ;;  %v1888_v41 = vld [vmem:[#allocation2 + $0x30] sm:$0xff] }
  0xfd   : > { %669 = vst.msk [vmem:[#allocation2 + $0x38] sm:$0xff] %vm362_vm0, %v652_v39  ;;  %v1891_v42 = vld [vmem:[#allocation2 + $0x70] sm:$0xff]  ;;  %v715_v43 = vsel %vm362_vm0, %v1888_v41, 0.0 }
  0xfe   : > { %677 = vst.msk [vmem:[#allocation2 + $0x78] sm:$0xff] %vm362_vm0, %v660_v40  ;;  %v739_v44 = vsel %vm362_vm0, %v1891_v42, 0.0  ;;  %716 = vadd.xlane.f32.xlu0 %v715_v43 }
  0xff   : > { %740 = vadd.xlane.f32.xlu2 %v739_v44 }
 0x104   : > { %v1898_v47 = vld [vmem:[#allocation2 + $0x38] sm:$0xff] }
 0x105   : > { %v1900_v48 = vld [vmem:[#allocation2 + $0x78] sm:$0xff]  ;;  %v718_v49 = vsel %vm362_vm0, %v1898_v47, 0.0 }
 0x106   : > { %v742_v50 = vsel %vm362_vm0, %v1900_v48, 0.0  ;;  %719 = vadd.xlane.f32.xlu1 %v718_v49 }
 0x107   : > { %743 = vadd.xlane.f32.xlu0 %v742_v50 }
 0x141   : > { %v699_v51 = vpop.xlane.xlu0 %698 }
 0x142   : > { %v723_v52 = vpop.xlane.xlu1 %722 }
 0x143   : > { %v745_v53 = vadd.f32 %v723_v52, %v699_v51 }
 0x145   : > { %v753_v54 = vmul.f32 0.015625, %v745_v53 }
 0x147   : > { %v1907_v57 = vsub.f32 %v1828_v45, %v753_v54  ;;  %v1910_v58 = vsub.f32 %v1831_v46, %v753_v54 }
 0x149   : > { %v702_v59 = vpop.xlane.xlu0 %701  ;;  %v785_v60 = vmul.f32 %v1910_v58, %v1910_v58  ;;  %v777_v61 = vmul.f32 %v1907_v57, %v1907_v57 }
 0x14a   : > { %v726_v62 = vpop.xlane.xlu1 %725 }
 0x14b   : > { %v746_v63 = vadd.f32 %v726_v62, %v702_v59  ;;  %v817_v0 = vsel %vm362_vm0, %v785_v60, 0.0  ;;  %v793_v3 = vsel %vm362_vm0, %v777_v61, 0.0 }
 0x14c   : > { %818 = vadd.xlane.f32.xlu0 %v817_v0  ;;  %794 = vadd.xlane.f32.xlu1 %v793_v3 }
 0x14d   : > { %v754_v45 = vmul.f32 0.015625, %v746_v63 }
 0x14f   : > { %v1919_v4 = vsub.f32 %v1838_v55, %v754_v45  ;;  %v1922_v46 = vsub.f32 %v1841_v56, %v754_v45 }
 0x151   : > { %v705_v5 = vpop.xlane.xlu2 %704  ;;  %v778_v6 = vmul.f32 %v1919_v4, %v1919_v4  ;;  %v786_v7 = vmul.f32 %v1922_v46, %v1922_v46 }
 0x152   : > { %v729_v8 = vpop.xlane.xlu0 %728 }
 0x153   : > { %v747_v9 = vadd.f32 %v729_v8, %v705_v5  ;;  %v796_v10 = vsel %vm362_vm0, %v778_v6, 0.0  ;;  %v820_v13 = vsel %vm362_vm0, %v786_v7, 0.0 }
 0x154   : > { %797 = vadd.xlane.f32.xlu2 %v796_v10  ;;  %821 = vadd.xlane.f32.xlu1 %v820_v13  ;;  %v1673_v13 = vmov 0  }
 0x155   : > { %v755_v55 = vmul.f32 0.015625, %v747_v9  ;;  %1602 = vset.pattern.permute.xlu2 %v1673_v13  ;;  %1603 = vset.pattern.permute.xlu0 %v1673_v13 }
 0x157   : > { %v1931_v14 = vsub.f32 %v1848_v1, %v755_v55  ;;  %v1934_v56 = vsub.f32 %v1851_v2, %v755_v55 }
 0x159   : > { %v708_v15 = vpop.xlane.xlu2 %707  ;;  %v779_v16 = vmul.f32 %v1931_v14, %v1931_v14  ;;  %v787_v17 = vmul.f32 %v1934_v56, %v1934_v56 }
 0x15a   : > { %v732_v18 = vpop.xlane.xlu1 %731 }
 0x15b   : > { %v748_v19 = vadd.f32 %v732_v18, %v708_v15  ;;  %v799_v20 = vsel %vm362_vm0, %v779_v16, 0.0  ;;  %v823_v23 = vsel %vm362_vm0, %v787_v17, 0.0 }
 0x15c   : > { %800 = vadd.xlane.f32.xlu2 %v799_v20  ;;  %824 = vadd.xlane.f32.xlu1 %v823_v23 }
 0x15d   : > { %v756_v1 = vmul.f32 0.015625, %v748_v19 }
 0x15f   : > { %v1943_v24 = vsub.f32 %v1858_v11, %v756_v1  ;;  %v1946_v2 = vsub.f32 %v1861_v12, %v756_v1 }
 0x161   : > { %v711_v25 = vpop.xlane.xlu2 %710  ;;  %v788_v26 = vmul.f32 %v1946_v2, %v1946_v2  ;;  %v780_v27 = vmul.f32 %v1943_v24, %v1943_v24 }
 0x162   : > { %v735_v28 = vpop.xlane.xlu1 %734 }
 0x163   : > { %v749_v29 = vadd.f32 %v735_v28, %v711_v25  ;;  %v826_v30 = vsel %vm362_vm0, %v788_v26, 0.0  ;;  %v802_v33 = vsel %vm362_vm0, %v780_v27, 0.0 }
 0x164   : > { %827 = vadd.xlane.f32.xlu2 %v826_v30  ;;  %803 = vadd.xlane.f32.xlu0 %v802_v33 }
 0x165   : > { %v757_v11 = vmul.f32 0.015625, %v749_v29 }
 0x167   : > { %v1955_v34 = vsub.f32 %v1868_v21, %v757_v11  ;;  %v1958_v12 = vsub.f32 %v1871_v22, %v757_v11 }
 0x169   : > { %v714_v35 = vpop.xlane.xlu0 %713  ;;  %v789_v36 = vmul.f32 %v1958_v12, %v1958_v12  ;;  %v781_v37 = vmul.f32 %v1955_v34, %v1955_v34 }
 0x16a   : > { %v738_v38 = vpop.xlane.xlu2 %737 }
 0x16b   : > { %v750_v39 = vadd.f32 %v738_v38, %v714_v35  ;;  %v829_v40 = vsel %vm362_vm0, %v789_v36, 0.0  ;;  %v805_v43 = vsel %vm362_vm0, %v781_v37, 0.0 }
 0x16c   : > { %830 = vadd.xlane.f32.xlu2 %v829_v40  ;;  %806 = vadd.xlane.f32.xlu0 %v805_v43 }
 0x16d   : > { %v758_v21 = vmul.f32 0.015625, %v750_v39 }
 0x16f   : > { %v1967_v44 = vsub.f32 %v1878_v31, %v758_v21  ;;  %v1970_v22 = vsub.f32 %v1881_v32, %v758_v21 }
 0x171   : > { %v717_v49 = vpop.xlane.xlu0 %716  ;;  %v790_v50 = vmul.f32 %v1970_v22, %v1970_v22  ;;  %v782_v51 = vmul.f32 %v1967_v44, %v1967_v44 }
 0x172   : > { %v741_v52 = vpop.xlane.xlu2 %740 }
 0x173   : > { %v751_v53 = vadd.f32 %v741_v52, %v717_v49  ;;  %v832_v54 = vsel %vm362_vm0, %v790_v50, 0.0  ;;  %v808_v59 = vsel %vm362_vm0, %v782_v51, 0.0 }
 0x174   : > { %833 = vadd.xlane.f32.xlu0 %v832_v54  ;;  %809 = vadd.xlane.f32.xlu1 %v808_v59 }
 0x175   : > { %v759_v31 = vmul.f32 0.015625, %v751_v53 }
 0x177   : > { %v1979_v60 = vsub.f32 %v1888_v41, %v759_v31  ;;  %v1982_v32 = vsub.f32 %v1891_v42, %v759_v31 }
 0x179   : > { %v720_v61 = vpop.xlane.xlu1 %719  ;;  %v791_v62 = vmul.f32 %v1982_v32, %v1982_v32  ;;  %v783_v63 = vmul.f32 %v1979_v60, %v1979_v60 }
 0x17a   : > { %v744_v0 = vpop.xlane.xlu0 %743 }
 0x17b   : > { %v752_v3 = vadd.f32 %v744_v0, %v720_v61  ;;  %v835_v45 = vsel %vm362_vm0, %v791_v62, 0.0  ;;  %v811_v5 = vsel %vm362_vm0, %v783_v63, 0.0  ;;  %v946_v0 = vld [vmem:[%s2006_s10 + $0x8] sm:$0xff] }
 0x17c   : > { %836 = vadd.xlane.f32.xlu0 %v835_v45  ;;  %812 = vadd.xlane.f32.xlu1 %v811_v5 }
 0x17d   : > { %v760_v41 = vmul.f32 0.015625, %v752_v3 }
 0x17f   : > { %v1991_v42 = vsub.f32 %v1898_v47, %v760_v41  ;;  %v1994_v6 = vsub.f32 %v1900_v48, %v760_v41  ;;  %v1672_v47 = vmov 1   ;;  %v945_v48 = vld [vmem:[%s2006_s10] sm:$0xff] }
 0x180   : > { %1604 = vset.pattern.permute.xlu1 %v1672_v47 }
 0x181   : > { %v792_v7 = vmul.f32 %v1994_v6, %v1994_v6  ;;  %v784_v8 = vmul.f32 %v1991_v42, %v1991_v42 }
 0x183   : > { %v838_v9 = vsel %vm362_vm0, %v792_v7, 0.0  ;;  %v814_v10 = vsel %vm362_vm0, %v784_v8, 0.0 }
 0x184   : > { %839 = vadd.xlane.f32.xlu1 %v838_v9  ;;  %815 = vadd.xlane.f32.xlu2 %v814_v10 }
 0x19d   : > { %1023 = vperm.xlu1 %1604, %v945_v48  }
 0x1a5   : > { %1608 = vset.pattern.permute.xlu1 %v1673_v13 }
 0x1bf   : > { %v819_v55 = vpop.xlane.xlu0 %818  ;;  %v795_v15 = vpop.xlane.xlu1 %794 }
 0x1c0   : > { %v841_v16 = vadd.f32 %v819_v55, %v795_v15 }
 0x1c2   : > { %v849_v17 = vmul.f32 0.015625, %v841_v16 }
 0x1c4   : > { %v857_v18 = vadd.f32 1e-05, %v849_v17 }
 0x1c6   : > { %1615 = vrsqrt.f32 %v857_v18  ;;  %vm871_vm2 = vweird.f32 %v857_v18 }
 0x1c7   : > { %v798_v19 = vpop.xlane.xlu2 %797  ;;  %v822_v20 = vpop.xlane.xlu1 %821 }
 0x1c8   : > { %v842_v23 = vadd.f32 %v822_v20, %v798_v19 }
 0x1ca   : > { %v850_v1 = vmul.f32 0.015625, %v842_v23 }
 0x1cc   : > { %v1616_v25 = vpop.eup %1615  ;;  %v858_v26 = vadd.f32 1e-05, %v850_v1  ;;  %v947_v1 = vld [vmem:[%s2006_s10 + $0x10] sm:$0xff] }
 0x1cd   : > { %v866_v27 = vmul.f32 %v1616_v25, %v857_v18  ;;  %vm872_vm1 = vweird.f32 %v1616_v25 }
 0x1ce   : > { %1617 = vrsqrt.f32 %v858_v26  ;;  %vm873_vm3 = vmor %vm871_vm2, %vm872_vm1  ;;  %vm881_vm5 = vweird.f32 %v858_v26 }
 0x1cf   : > { %v867_v28 = vmul.f32 %v1616_v25, %v866_v27  ;;  %v801_v29 = vpop.xlane.xlu2 %800  ;;  %v825_v30 = vpop.xlane.xlu1 %824 }
 0x1d0   : > { %v843_v33 = vadd.f32 %v825_v30, %v801_v29 }
 0x1d1   : > { %v868_v11 = vmul.f32 0.5, %v867_v28 }
 0x1d2   : > { %v851_v35 = vmul.f32 0.015625, %v843_v33 }
 0x1d3   : > { %v869_v36 = vsub.f32 1.5, %v868_v11 }
 0x1d4   : > { %v1618_v37 = vpop.eup %1617  ;;  %v859_v38 = vadd.f32 1e-05, %v851_v35 }
 0x1d5   : > { %v870_v39 = vmul.f32 %v1616_v25, %v869_v36  ;;  %v876_v40 = vmul.f32 %v1618_v37, %v858_v26  ;;  %vm882_vm4 = vweird.f32 %v1618_v37  ;;  %v948_v36 = vld [vmem:[%s2006_s10 + $0x18] sm:$0xff] }
 0x1d6   : > { %1619 = vrsqrt.f32 %v859_v38  ;;  %vm883_vm6 = vmor %vm881_vm5, %vm882_vm4  ;;  %vm891_vm8 = vweird.f32 %v859_v38 }
 0x1d7   : > { %v874_v43 = vsel %vm873_vm3, %v1616_v25, %v870_v39  ;;  %v877_v21 = vmul.f32 %v1618_v37, %v876_v40  ;;  %v828_v49 = vpop.xlane.xlu2 %827  ;;  %v804_v50 = vpop.xlane.xlu0 %803 }
 0x1d8   : > { %v953_v51 = vmul.f32 %v945_v48, %v874_v43  ;;  %v844_v52 = vadd.f32 %v828_v49, %v804_v50 }
 0x1d9   : > { %v878_v53 = vmul.f32 0.5, %v877_v21 }
 0x1da   : > { %v852_v54 = vmul.f32 0.015625, %v844_v52  ;;  %967 = vperm.xlu2 %1602, %v953_v51  }
 0x1db   : > { %v879_v59 = vsub.f32 1.5, %v878_v53 }
 0x1dc   : > { %v1620_v31 = vpop.eup %1619  ;;  %v860_v61 = vadd.f32 1e-05, %v852_v54 }
 0x1dd   : > { %v886_v62 = vmul.f32 %v1620_v31, %v859_v38  ;;  %v880_v63 = vmul.f32 %v1618_v37, %v879_v59  ;;  %vm892_vm7 = vweird.f32 %v1620_v31 }
 0x1de   : > { %1621 = vrsqrt.f32 %v860_v61  ;;  %vm893_vm9 = vmor %vm891_vm8, %vm892_vm7  ;;  %vm901_vm11 = vweird.f32 %v860_v61 }
 0x1df   : > { %v887_v3 = vmul.f32 %v1620_v31, %v886_v62  ;;  %v831_v45 = vpop.xlane.xlu2 %830  ;;  %v807_v5 = vpop.xlane.xlu0 %806  ;;  %v884_v41 = vsel %vm883_vm6, %v1618_v37, %v880_v63 }
 0x1e0   : > { %v845_v7 = vadd.f32 %v831_v45, %v807_v5  ;;  %v954_v8 = vmul.f32 %v946_v0, %v884_v41 }
 0x1e1   : > { %v888_v9 = vmul.f32 0.5, %v887_v3 }
 0x1e2   : > { %v853_v10 = vmul.f32 0.015625, %v845_v7  ;;  %1605 = vset.pattern.permute.xlu2 %v1672_v47  ;;  %972 = vperm.xlu0 %1603, %v954_v8  }
 0x1e3   : > { %v889_v48 = vsub.f32 1.5, %v888_v9  ;;  %1028 = vperm.xlu2 %1605, %v946_v0  }
 0x1e4   : > { %v1622_v55 = vpop.eup %1621  ;;  %v861_v15 = vadd.f32 1e-05, %v853_v10 }
 0x1e5   : > { %v896_v16 = vmul.f32 %v1622_v55, %v860_v61  ;;  %v890_v17 = vmul.f32 %v1620_v31, %v889_v48  ;;  %vm902_vm10 = vweird.f32 %v1622_v55 }
 0x1e6   : > { %1623 = vrsqrt.f32 %v861_v15  ;;  %vm903_vm12 = vmor %vm901_vm11, %vm902_vm10  ;;  %vm911_vm14 = vweird.f32 %v861_v15 }
 0x1e7   : > { %v897_v18 = vmul.f32 %v1622_v55, %v896_v16  ;;  %v834_v19 = vpop.xlane.xlu0 %833  ;;  %v810_v20 = vpop.xlane.xlu1 %809  ;;  %v894_v23 = vsel %vm893_vm9, %v1620_v31, %v890_v17  ;;  %v949_v31 = vld [vmem:[%s2006_s10 + $0x20] sm:$0xff] }
 0x1e8   : > { %v846_v25 = vadd.f32 %v834_v19, %v810_v20  ;;  %v955_v28 = vmul.f32 %v947_v1, %v894_v23 }
 0x1e9   : > { %v898_v26 = vmul.f32 0.5, %v897_v18 }
 0x1ea   : > { %v854_v27 = vmul.f32 0.015625, %v846_v25  ;;  %v951_v25 = vld [vmem:[%s2006_s10 + $0x30] sm:$0xff] }
 0x1eb   : > { %v899_v29 = vsub.f32 1.5, %v898_v26  ;;  %1606 = vset.pattern.permute.xlu2 %v1673_v13 }
 0x1ec   : > { %v1624_v30 = vpop.eup %1623  ;;  %v862_v33 = vadd.f32 1e-05, %v854_v27  ;;  %977 = vperm.xlu2 %1606, %v955_v28  }
 0x1ed   : > { %v906_v11 = vmul.f32 %v1624_v30, %v861_v15  ;;  %v900_v35 = vmul.f32 %v1622_v55, %v899_v29  ;;  %vm912_vm13 = vweird.f32 %v1624_v30 }
 0x1ee   : > { %1625 = vrsqrt.f32 %v862_v33  ;;  %vm913_vm15 = vmor %vm911_vm14, %vm912_vm13  ;;  %vm921_vm2 = vweird.f32 %v862_v33 }
 0x1ef   : > { %v907_v37 = vmul.f32 %v1624_v30, %v906_v11  ;;  %v837_v38 = vpop.xlane.xlu0 %836  ;;  %v813_v39 = vpop.xlane.xlu1 %812  ;;  %v904_v40 = vsel %vm903_vm12, %v1622_v55, %v900_v35  ;;  %v950_v55 = vld [vmem:[%s2006_s10 + $0x28] sm:$0xff]  ;;  %v952_v11 = vld [vmem:[%s2006_s10 + $0x38] sm:$0xff] }
 0x1f0   : > { %v847_v43 = vadd.f32 %v837_v38, %v813_v39  ;;  %v956_v21 = vmul.f32 %v948_v36, %v904_v40  ;;  %v1554_v40 = vld [vmem:[%s2121_s2] sm:$0xff] }
 0x1f1   : > { %v908_v49 = vmul.f32 0.5, %v907_v37  ;;  %v1555_v37 = vld [vmem:[%s2121_s2 + $0x8] sm:$0xff] }
 0x1f2   : > { %v855_v50 = vmul.f32 0.015625, %v847_v43  ;;  %982 = vperm.xlu1 %1608, %v956_v21   ;;  %1127 = vmatpush.bf16.msra.mxu2 %v1555_v37 }
 0x1f3   : > { %v909_v51 = vsub.f32 1.5, %v908_v49  ;;  %1557 = vmatpush.bf16.msra.mxu3 %v1555_v37 }
 0x1f4   : > { %v1626_v52 = vpop.eup %1625  ;;  %v863_v53 = vadd.f32 1e-05, %v855_v50  ;;  %1607 = vset.pattern.permute.xlu2 %v1672_v47 }
 0x1f5   : > { %v916_v54 = vmul.f32 %v1626_v52, %v862_v33  ;;  %1033 = vperm.xlu2 %1607, %v947_v1   ;;  %v910_v59 = vmul.f32 %v1624_v30, %v909_v51  ;;  %vm922_vm1 = vweird.f32 %v1626_v52 }
 0x1f6   : > { %1627 = vrsqrt.f32 %v863_v53  ;;  %vm923_vm3 = vmor %vm921_vm2, %vm922_vm1  ;;  %vm931_vm5 = vweird.f32 %v863_v53  ;;  %1128 = vmatpush.bf16.msra.mxu2 %v1554_v40 }
 0x1f7   : > { %v917_v61 = vmul.f32 %v1626_v52, %v916_v54  ;;  %v816_v62 = vpop.xlane.xlu2 %815  ;;  %v840_v63 = vpop.xlane.xlu1 %839  ;;  %v914_v0 = vsel %vm913_vm15, %v1624_v30, %v910_v59  ;;  %1558 = vmatpush.bf16.msra.mxu3 %v1554_v40 }
 0x1f8   : > { %v848_v3 = vadd.f32 %v840_v63, %v816_v62  ;;  %v957_v45 = vmul.f32 %v949_v31, %v914_v0 }
 0x1f9   : > { %v918_v5 = vmul.f32 0.5, %v917_v61 }
 0x1fa   : > { %v856_v41 = vmul.f32 0.015625, %v848_v3  ;;  %1609 = vset.pattern.permute.xlu1 %v1672_v47  ;;  %987 = vperm.xlu0 %1603, %v957_v45  }
 0x1fb   : > { %v919_v7 = vsub.f32 1.5, %v918_v5  ;;  %1038 = vperm.xlu1 %1609, %v948_v36  }
 0x1fc   : > { %v1628_v8 = vpop.eup %1627  ;;  %v864_v9 = vadd.f32 1e-05, %v856_v41 }
 0x1fd   : > { %v926_v10 = vmul.f32 %v1628_v8, %v863_v53  ;;  %1610 = vset.pattern.permute.xlu2 %v1673_v13  ;;  %v920_v48 = vmul.f32 %v1626_v52, %v919_v7  ;;  %vm932_vm4 = vweird.f32 %v1628_v8 }
 0x1fe   : > { %1629 = vrsqrt.f32 %v864_v9  ;;  %vm933_vm6 = vmor %vm931_vm5, %vm932_vm4  ;;  %vm941_vm8 = vweird.f32 %v864_v9 }
 0x1ff   : > { %v927_v15 = vmul.f32 %v1628_v8, %v926_v10  ;;  %v924_v16 = vsel %vm923_vm3, %v1626_v52, %v920_v48 }
 0x200   : > { %v958_v17 = vmul.f32 %v950_v55, %v924_v16 }
 0x201   : > { %v928_v18 = vmul.f32 0.5, %v927_v15 }
 0x202   : > { %1611 = vset.pattern.permute.xlu0 %v1672_v47  ;;  %992 = vperm.xlu2 %1610, %v958_v17  }
 0x203   : > { %v929_v19 = vsub.f32 1.5, %v928_v18  ;;  %1043 = vperm.xlu1 %1609, %v949_v31   ;;  %1048 = vperm.xlu0 %1611, %v950_v55  }
 0x204   : > { %v1630_v20 = vpop.eup %1629 }
 0x205   : > { %v936_v23 = vmul.f32 %v1630_v20, %v864_v9  ;;  %v930_v1 = vmul.f32 %v1628_v8, %v929_v19  ;;  %vm942_vm7 = vweird.f32 %v1630_v20 }
 0x206   : > { %vm943_vm9 = vmor %vm941_vm8, %vm942_vm7 }
 0x207   : > { %v937_v26 = vmul.f32 %v1630_v20, %v936_v23  ;;  %v934_v27 = vsel %vm933_vm6, %v1628_v8, %v930_v1 }
 0x208   : > { %v959_v28 = vmul.f32 %v951_v25, %v934_v27 }
 0x209   : > { %v938_v29 = vmul.f32 0.5, %v937_v26 }
 0x20a   : > { %997 = vperm.xlu2 %1610, %v959_v28  }
 0x20b   : > { %v939_v30 = vsub.f32 1.5, %v938_v29  ;;  %1612 = vset.pattern.permute.xlu1 %v1673_v13 }
 0x20d   : > { %v940_v33 = vmul.f32 %v1630_v20, %v939_v30 }
 0x20f   : > { %v944_v35 = vsel %vm943_vm9, %v1630_v20, %v940_v33  ;;  %v1024_v38 = vpop.permute.xlu1 %1023 }
 0x210   : > { %v960_v36 = vmul.f32 %v952_v11, %v944_v35 }
 0x212   : > { %1613 = vset.pattern.permute.xlu2 %v1672_v47  ;;  %1002 = vperm.xlu1 %1612, %v960_v36  }
 0x213   : > { %1053 = vperm.xlu2 %1613, %v951_v25  }
 0x21a   : > { %1614 = vset.pattern.permute.xlu1 %v1672_v47 }
 0x21b   : > { %1058 = vperm.xlu1 %1614, %v952_v11  }
 0x234   : > { %v968_v13 = vpop.permute.xlu2 %967 }
 0x235   : > { %v1013_v39 = vmul.f32 %v968_v13, %v1910_v58  ;;  %v1005_v47 = vmul.f32 %v968_v13, %v1907_v57 }
 0x237   : > { %v2036_v43 = vadd.f32 %v1024_v38, %v1013_v39  ;;  %v1061_v52 = vadd.f32 %v1024_v38, %v1005_v47 }
 0x23d   : > { %v1029_v51 = vpop.permute.xlu2 %1028 }
 0x246   : > { %v978_v31 = vpop.permute.xlu2 %977 }
 0x247   : > { %v1007_v63 = vmul.f32 %v978_v31, %v1931_v14  ;;  %v1015_v57 = vmul.f32 %v978_v31, %v1934_v56 }
 0x24f   : > { %v1034_v62 = vpop.permute.xlu2 %1033 }
 0x250   : > { %v1063_v3 = vadd.f32 %v1034_v62, %v1007_v63  ;;  %v1071_v45 = vadd.f32 %v1034_v62, %v1015_v57 }
 0x254   : > { %v973_v21 = vpop.permute.xlu0 %972 }
 0x255   : > { %v1006_v49 = vmul.f32 %v973_v21, %v1919_v4  ;;  %v1014_v50 = vmul.f32 %v973_v21, %v1922_v46 }
 0x257   : > { %v1062_v53 = vadd.f32 %v1029_v51, %v1006_v49  ;;  %v1070_v54 = vadd.f32 %v1029_v51, %v1014_v50 }
 0x259   : > { %v1077_v58 = vpack.c.bf16 %v1062_v53, %v1061_v52  ;;  %v1081_v59 = vpack.c.bf16 %v1070_v54, %v2036_v43 }
 0x25b   : > { %1516 = vmatmul.msk.bf16.vlgmr.msra.gmra.mxu2 %vm362_vm0, %v1077_v58 }
 0x25c   : > { %v993_v10 = vpop.permute.xlu2 %992 }
 0x25d   : > { %v1010_v56 = vmul.f32 %v993_v10, %v1967_v44 }
 0x264   : > { %v983_v61 = vpop.permute.xlu1 %982  ;;  %v998_v23 = vpop.permute.xlu2 %997 }
 0x265   : > { %v1008_v4 = vmul.f32 %v983_v61, %v1943_v24  ;;  %v1016_v46 = vmul.f32 %v983_v61, %v1946_v2  ;;  %v1018_v24 = vmul.f32 %v993_v10, %v1970_v22  ;;  %v1011_v22 = vmul.f32 %v998_v23, %v1979_v60 }
 0x26c   : > { %v988_v7 = vpop.permute.xlu0 %987 }
 0x26d   : > { %v1039_v0 = vpop.permute.xlu1 %1038  ;;  %v1009_v2 = vmul.f32 %v988_v7, %v1955_v34  ;;  %v1017_v55 = vmul.f32 %v988_v7, %v1958_v12  ;;  %v1054_v44 = vpop.permute.xlu2 %1053  ;;  %v1019_v34 = vmul.f32 %v998_v23, %v1982_v32 }
 0x26e   : > { %v1064_v5 = vadd.f32 %v1039_v0, %v1008_v4  ;;  %v1072_v41 = vadd.f32 %v1039_v0, %v1016_v46  ;;  %v1067_v27 = vadd.f32 %v1054_v44, %v1011_v22 }
 0x26f   : > { %v1075_v28 = vadd.f32 %v1054_v44, %v1019_v34 }
 0x270   : > { %v1078_v8 = vpack.c.bf16 %v1064_v5, %v1063_v3  ;;  %v1082_v9 = vpack.c.bf16 %v1072_v41, %v1071_v45 }
 0x272   : > { %1517 = vmatmul.msk.bf16.gmra.mxu2 %vm362_vm0, %v1078_v8  ;;  %1521 = vmatmul.msk.bf16.vlgmr.msra.gmra.mxu3 %vm362_vm0, %v1082_v9 }
 0x275   : > { %v1049_v14 = vpop.permute.xlu0 %1048  ;;  %v1044_v48 = vpop.permute.xlu1 %1043 }
 0x276   : > { %v1066_v15 = vadd.f32 %v1049_v14, %v1010_v56  ;;  %v1074_v16 = vadd.f32 %v1049_v14, %v1018_v24  ;;  %v1065_v17 = vadd.f32 %v1044_v48, %v1009_v2  ;;  %v1073_v18 = vadd.f32 %v1044_v48, %v1017_v55 }
 0x278   : > { %v1079_v19 = vpack.c.bf16 %v1066_v15, %v1065_v17  ;;  %v1083_v20 = vpack.c.bf16 %v1074_v16, %v1073_v18 }
 0x282   : > { %1518 = vmatmul.msk.bf16.gmra.mxu2 %vm362_vm0, %v1079_v19  ;;  %1522 = vmatmul.msk.bf16.gmra.mxu3 %vm362_vm0, %v1083_v20 }
 0x284   : > { %v1003_v1 = vpop.permute.xlu1 %1002 }
 0x285   : > { %v1012_v12 = vmul.f32 %v1003_v1, %v1991_v42  ;;  %v1020_v25 = vmul.f32 %v1003_v1, %v1994_v6 }
 0x28d   : > { %v1059_v26 = vpop.permute.xlu1 %1058 }
 0x28e   : > { %v1068_v29 = vadd.f32 %v1059_v26, %v1012_v12  ;;  %v1076_v30 = vadd.f32 %v1059_v26, %v1020_v25 }
 0x290   : > { %v1080_v33 = vpack.c.bf16 %v1068_v29, %v1067_v27  ;;  %v1084_v11 = vpack.c.bf16 %v1076_v30, %v1075_v28 }
 0x292   : > { %1519 = vmatmul.msk.bf16.gmra.mxu2 %vm362_vm0, %v1080_v33  ;;  %1523 = vmatmul.msk.bf16.gmra.mxu3 %vm362_vm0, %v1084_v11 }
 0x2a2   : > { %1520 = vmatmul.msk.bf16.gmra.mxu2 %vm362_vm0, %v1081_v59 }
 0x2de   : > { %v1130_v60 = vpop.f32.mrf.mxu2 }
 0x2df   : > { %v1170_v32 = vmax.f32 %v1130_v60, 0.0 }
 0x2e1   : > { %1186 = vst [vmem:[%s2064_s23] sm:$0xff] %v1170_v32 }
 0x2e6   : > { %v1132_v42 = vpop.f32.mrf.mxu2 }
 0x2e7   : > { %v1171_v6 = vmax.f32 %v1132_v42, 0.0 }
 0x2e8   : > { %v1270_v5 = vld [vmem:[%s2064_s23] sm:$0xff] (%p1734_p6) }
 0x2e9   : > { %1187 = vst [vmem:[%s2064_s23 + $0x8] sm:$0xff] %v1171_v6 }
 0x2ea   : > { %1271 = vst [vmem:[%s1211_s27] sm:$0xff] (%p1734_p6), %v1270_v5 }
 0x2f0   : > { %v1272_v41 = vld [vmem:[%s2064_s23 + $0x8] sm:$0xff] (%p1734_p6) }
 0x2f1   : > { %1273 = vst [vmem:[%s1211_s27 + $0x8] sm:$0xff] (%p1734_p6), %v1272_v41 }
 0x2f5   : > { %v1135_v35 = vpop.f32.mrf.mxu2  ;;  %v1155_v36 = vpop.f32.mrf.mxu3 }
 0x2f6   : > { %v1172_v37 = vmax.f32 %v1135_v35, 0.0  ;;  %v1180_v13 = vmax.f32 %v1155_v36, 0.0 }
 0x2f8   : > { %1188 = vst [vmem:[%s2064_s23 + $0x10] sm:$0xff] %v1172_v37 }
 0x2f9   : > { %1196 = vst [vmem:[%s2064_s23 + $0x50] sm:$0xff] %v1180_v13 }
 0x2fd   : > { %v1137_v38 = vpop.f32.mrf.mxu2  ;;  %v1157_v39 = vpop.f32.mrf.mxu3 }
 0x2fe   : > { %v1173_v40 = vmax.f32 %v1137_v38, 0.0  ;;  %v1181_v43 = vmax.f32 %v1157_v39, 0.0 }
 0x2ff   : > { %v1274_v7 = vld [vmem:[%s2064_s23 + $0x10] sm:$0xff] (%p1734_p6) }
 0x300   : > { %1189 = vst [vmem:[%s2064_s23 + $0x18] sm:$0xff] %v1173_v40  ;;  %v1290_v2 = vld [vmem:[%s2064_s23 + $0x50] sm:$0xff] (%p1734_p6) }
 0x301   : > { %1197 = vst [vmem:[%s2064_s23 + $0x58] sm:$0xff] %v1181_v43 }
 0x302   : > { %1275 = vst [vmem:[%s1211_s27 + $0x10] sm:$0xff] (%p1734_p6), %v1274_v7 }
 0x303   : > { %1291 = vst [vmem:[%s1211_s27 + $0x90] sm:$0xff] (%p1734_p6), %v1290_v2 }
 0x305   : > { %v1140_v47 = vpop.f32.mrf.mxu2  ;;  %v1160_v21 = vpop.f32.mrf.mxu3 }
 0x306   : > { %v1174_v49 = vmax.f32 %v1140_v47, 0.0  ;;  %v1182_v50 = vmax.f32 %v1160_v21, 0.0 }
 0x307   : > { %v1276_v8 = vld [vmem:[%s2064_s23 + $0x18] sm:$0xff] (%p1734_p6) }
 0x308   : > { %1190 = vst [vmem:[%s2064_s23 + $0x20] sm:$0xff] %v1174_v49  ;;  %v1292_v55 = vld [vmem:[%s2064_s23 + $0x58] sm:$0xff] (%p1734_p6) }
 0x309   : > { %1198 = vst [vmem:[%s2064_s23 + $0x60] sm:$0xff] %v1182_v50 }
 0x30a   : > { %1277 = vst [vmem:[%s1211_s27 + $0x18] sm:$0xff] (%p1734_p6), %v1276_v8 }
 0x30b   : > { %1293 = vst [vmem:[%s1211_s27 + $0x98] sm:$0xff] (%p1734_p6), %v1292_v55 }
 0x30d   : > { %v1142_v51 = vpop.f32.mrf.mxu2  ;;  %v1162_v52 = vpop.f32.mrf.mxu3 }
 0x30e   : > { %v1175_v53 = vmax.f32 %v1142_v51, 0.0  ;;  %v1183_v54 = vmax.f32 %v1162_v52, 0.0 }
 0x30f   : > { %v1278_v9 = vld [vmem:[%s2064_s23 + $0x20] sm:$0xff] (%p1734_p6) }
 0x310   : > { %1191 = vst [vmem:[%s2064_s23 + $0x28] sm:$0xff] %v1175_v53  ;;  %v1294_v15 = vld [vmem:[%s2064_s23 + $0x60] sm:$0xff] (%p1734_p6) }
 0x311   : > { %1199 = vst [vmem:[%s2064_s23 + $0x68] sm:$0xff] %v1183_v54 }
 0x312   : > { %1279 = vst [vmem:[%s1211_s27 + $0x20] sm:$0xff] (%p1734_p6), %v1278_v9 }
 0x313   : > { %1295 = vst [vmem:[%s1211_s27 + $0xa0] sm:$0xff] (%p1734_p6), %v1294_v15 }
 0x315   : > { %v1145_v58 = vpop.f32.mrf.mxu2  ;;  %v1165_v59 = vpop.f32.mrf.mxu3 }
 0x316   : > { %v1176_v31 = vmax.f32 %v1145_v58, 0.0  ;;  %v1184_v61 = vmax.f32 %v1165_v59, 0.0 }
 0x317   : > { %v1280_v10 = vld [vmem:[%s2064_s23 + $0x28] sm:$0xff] (%p1734_p6) }
 0x318   : > { %1192 = vst [vmem:[%s2064_s23 + $0x30] sm:$0xff] %v1176_v31  ;;  %v1296_v16 = vld [vmem:[%s2064_s23 + $0x68] sm:$0xff] (%p1734_p6) }
 0x319   : > { %1200 = vst [vmem:[%s2064_s23 + $0x70] sm:$0xff] %v1184_v61 }
 0x31a   : > { %1281 = vst [vmem:[%s1211_s27 + $0x28] sm:$0xff] (%p1734_p6), %v1280_v10 }
 0x31b   : > { %1297 = vst [vmem:[%s1211_s27 + $0xa8] sm:$0xff] (%p1734_p6), %v1296_v16 }
 0x31d   : > { %v1147_v62 = vpop.f32.mrf.mxu2  ;;  %v1167_v63 = vpop.f32.mrf.mxu3 }
 0x31e   : > { %v1177_v57 = vmax.f32 %v1147_v62, 0.0  ;;  %v1185_v4 = vmax.f32 %v1167_v63, 0.0 }
 0x31f   : > { %v1282_v14 = vld [vmem:[%s2064_s23 + $0x30] sm:$0xff] (%p1734_p6) }
 0x320   : > { %1193 = vst [vmem:[%s2064_s23 + $0x38] sm:$0xff] %v1177_v57  ;;  %v1298_v17 = vld [vmem:[%s2064_s23 + $0x70] sm:$0xff] (%p1734_p6) }
 0x321   : > { %1201 = vst [vmem:[%s2064_s23 + $0x78] sm:$0xff] %v1185_v4 }
 0x322   : > { %1283 = vst [vmem:[%s1211_s27 + $0x30] sm:$0xff] (%p1734_p6), %v1282_v14 }
 0x323   : > { %1299 = vst [vmem:[%s1211_s27 + $0xb0] sm:$0xff] (%p1734_p6), %v1298_v17 }
 0x325   : > { %v1150_v46 = vpop.f32.mrf.mxu2 }
 0x326   : > { %v1178_v0 = vmax.f32 %v1150_v46, 0.0 }
 0x327   : > { %v1284_v48 = vld [vmem:[%s2064_s23 + $0x38] sm:$0xff] (%p1734_p6) }
 0x328   : > { %1194 = vst [vmem:[%s2064_s23 + $0x40] sm:$0xff] %v1178_v0  ;;  %v1300_v18 = vld [vmem:[%s2064_s23 + $0x78] sm:$0xff] (%p1734_p6) }
 0x329   : > { %1285 = vst [vmem:[%s1211_s27 + $0x38] sm:$0xff] (%p1734_p6), %v1284_v48 }
 0x32a   : > { %1301 = vst [vmem:[%s1211_s27 + $0xb8] sm:$0xff] (%p1734_p6), %v1300_v18 }
 0x32c   : > { %1208 = sbr.rel (!%p1734_p6) target bundleno = 825 (0x339), region = 89 }
 0x32d   : > { %v1152_v3 = vpop.f32.mrf.mxu2 }
 0x32e   : > { %v1179_v45 = vmax.f32 %v1152_v3, 0.0 }
 0x32f   : > { %v1286_v56 = vld [vmem:[%s2064_s23 + $0x40] sm:$0xff] (%p1734_p6) }
 0x330   : > { %1195 = vst [vmem:[%s2064_s23 + $0x48] sm:$0xff] %v1179_v45 }
 0x331   : > { %1287 = vst [vmem:[%s1211_s27 + $0x80] sm:$0xff] %v1286_v56 }
 0x337   : > { %v1288_v24 = vld [vmem:[%s2064_s23 + $0x48] sm:$0xff] }
 0x338   : > { %1289 = vst [vmem:[%s1211_s27 + $0x88] sm:$0xff] %v1288_v24 }
 0x339 PF: > { %s14_s19 = sadd.s32 1, %s1669_s19   ;;  %s2125_s15 = smov %s1657_s16 }
 0x33a   : > { %p11_p12 = scmp.ge.s32.totalorder %s14_s19, 4   ;;  %s2126_s16 = smov %s1739_s25 }
 0x33b   : > { %s2127_s17 = smov %s1665_s18  ;;  %s2128_s18 = smov %s2130_s20 }
 0x33c   :  { %13 = sbr.rel (!%p11_p12) target bundleno = 3 (0x3), region = 164 }

</bundles_post_ra>
